<compile_context>
chip_gen: v5e
topology: v5e:2x2
jax: 0.10.0
libtpu: 0.0.40
codegen_flags: <defaults>
</compile_context>

<pallas_src>
import functools

import jax
import jax.numpy as jnp
from jax import lax
from jax.experimental import pallas as pl
from jax.experimental.pallas import tpu as pltpu


def _moving_avg_kernel(x_ref, o_ref, *, kernel_size, pad):
    """x_ref: (blk_B, C, L); o_ref: (blk_B, C, M), M = L + 2*pad - kernel_size + 1."""
    blk_B, C, L = x_ref.shape
    M = o_ref.shape[2]

    x = x_ref[...]                                       # whole block, VMEM resident

    # Edge-replicate padding along the lane (sequence) axis, built in VMEM.
    if pad > 0:
        front = jnp.broadcast_to(x[:, :, 0:1], (blk_B, C, pad))
        end = jnp.broadcast_to(x[:, :, L - 1:L], (blk_B, C, pad))
        xp = jnp.concatenate([front, x, end], axis=2)    # (blk_B, C, L + 2*pad)
    else:
        xp = x

    # Stride-1 moving sums: kernel_size statically shifted lane slices summed
    # on the VPU (no masks, no MXU).
    # TODO(synk): for large kernel_size (~25) a cumsum-difference would cut the
    # VALU work ~2x; the shifted-add loop is kept for small k.
    acc = xp[:, :, 0:M].astype(jnp.float32)
    for j in range(1, kernel_size):
        acc = acc + xp[:, :, j:j + M]

    o_ref[...] = (acc * (1.0 / kernel_size)).astype(o_ref.dtype)


def _pick_block_b(B, C, L, target_bytes=1 << 20):
    """Largest divisor of B with <= target_bytes per input block; keep >= 2 grid
    steps whenever B >= 2 so pipelining / megacore sharding have work."""
    bytes_per_row = C * L * 4
    cap = max(1, B // 2)
    best = 1
    for d in range(1, cap + 1):
        if B % d == 0 and d * bytes_per_row <= target_bytes:
            best = d
    return best


def moving_avg(x, kernel_size, stride):
    """x: (B, L, C) float32 -> (B, L_out, C); matches moving_avg.forward."""
    B, L, C = x.shape
    pad = (kernel_size - 1) // 2
    Lp = L + 2 * pad
    M = Lp - kernel_size + 1                 # number of stride-1 windows
    # L_out = (Lp - kernel_size) // stride + 1  (== ceil(M / stride))

    # (B, L, C) -> (B, C, L): sequence axis on the 128-lane axis.
    xt = jnp.transpose(x, (0, 2, 1)).astype(jnp.float32)

    blk_B = _pick_block_b(B, C, L)
    grid = (B // blk_B,)

    kernel = functools.partial(_moving_avg_kernel,
                               kernel_size=kernel_size, pad=pad)
    out_bcm = pl.pallas_call(
        kernel,
        out_shape=jax.ShapeDtypeStruct((B, C, M), jnp.float32),
        grid=grid,
        in_specs=[pl.BlockSpec((blk_B, C, L), lambda b: (b, 0, 0))],
        out_specs=pl.BlockSpec((blk_B, C, M), lambda b: (b, 0, 0)),
        compiler_params=pltpu.CompilerParams(
            dimension_semantics=("parallel",)),
    )(xt)

    if stride > 1:
        # Exact: strided avg-pool == stride-1 avg-pool sampled every `stride`.
        out_bcm = lax.slice(out_bcm, (0, 0, 0), (B, C, M), (1, 1, stride))

    # (B, C, L_out) -> (B, L_out, C)
    return jnp.transpose(out_bcm, (0, 2, 1))


def moving_avg_reference(x, kernel_size, stride):
    """Plain-JAX / XLA reference mirroring the PyTorch forward exactly."""
    pad = (kernel_size - 1) // 2
    front = jnp.repeat(x[:, 0:1, :], pad, axis=1)
    end = jnp.repeat(x[:, -1:, :], pad, axis=1)
    xp = jnp.concatenate([front, x, end], axis=1)
    s = lax.reduce_window(xp, 0.0, lax.add,
                          window_dimensions=(1, kernel_size, 1),
                          window_strides=(1, stride, 1),
                          padding="VALID")
    return s / kernel_size


if __name__ == "__main__":
    # Small shapes consistent with the module: x is (batch, seq_len, channels).
    B, L, C = 2, 16, 8
    key = jax.random.PRNGKey(0)
    x = jax.random.normal(key, (B, L, C), jnp.float32)

    # Typical trend-extraction usage: odd kernel, stride 1 (output length L).
    k1, s1 = 5, 1
    out1 = moving_avg(x, k1, s1)
    jax.block_until_ready(out1)
    ref1 = moving_avg_reference(x, k1, s1)
    assert out1.shape == ref1.shape == (B, L, C)
    assert jnp.allclose(out1, ref1, atol=1e-5, rtol=1e-5)

    # Strided variant exercises the downsampling path.
    k2, s2 = 5, 2
    out2 = moving_avg(x, k2, s2)
    jax.block_until_ready(out2)
    ref2 = moving_avg_reference(x, k2, s2)
    assert out2.shape == ref2.shape
    assert jnp.allclose(out2, ref2, atol=1e-5, rtol=1e-5)

    print("KERNEL_OK")
</pallas_src>

<mosaic_0001>
module attributes {stable_mosaic.version = 11 : i64} {
  func.func @_moving_avg_kernel(%arg0: i32, %arg1: memref<1x8x16xf32, #tpu.memory_space<vmem>>, %arg2: memref<1x8x16xf32, #tpu.memory_space<vmem>>) attributes {dimension_semantics = [#tpu.dimension_semantics<parallel>], iteration_bounds = array<i64: 2>, scalar_prefetch = 0 : i64, scratch_operands = 0 : i64, tpu.core_type = #tpu.core_type<tc>, window_params = [{transform_indices = @transform_0, window_bounds = array<i64: 1, 8, 16>}, {transform_indices = @transform_1, window_bounds = array<i64: 1, 8, 16>}]} {
    %c0 = arith.constant 0 : index
    %c0_0 = arith.constant 0 : index
    %c0_1 = arith.constant 0 : index
    %0 = vector.load %arg1[%c0, %c0_0, %c0_1] : memref<1x8x16xf32, #tpu.memory_space<vmem>>, vector<1x8x16xf32>
    %1 = vector.extract_strided_slice %0 {offsets = [0, 0, 0], sizes = [1, 8, 1], strides = [1, 1, 1]} : vector<1x8x16xf32> to vector<1x8x1xf32>
    %2 = vector.shape_cast %1 : vector<1x8x1xf32> to vector<1x8x1xf32>
    %3 = vector.broadcast %2 : vector<1x8x1xf32> to vector<1x8x2xf32>
    %4 = vector.extract_strided_slice %0 {offsets = [0, 0, 15], sizes = [1, 8, 1], strides = [1, 1, 1]} : vector<1x8x16xf32> to vector<1x8x1xf32>
    %5 = vector.shape_cast %4 : vector<1x8x1xf32> to vector<1x8x1xf32>
    %6 = vector.broadcast %5 : vector<1x8x1xf32> to vector<1x8x2xf32>
    %7 = tpu.concatenate %3, %0, %6 in 2 : vector<1x8x2xf32>, vector<1x8x16xf32>, vector<1x8x2xf32> -> vector<1x8x20xf32>
    %8 = vector.extract_strided_slice %7 {offsets = [0, 0, 0], sizes = [1, 8, 16], strides = [1, 1, 1]} : vector<1x8x20xf32> to vector<1x8x16xf32>
    %9 = vector.extract_strided_slice %7 {offsets = [0, 0, 1], sizes = [1, 8, 16], strides = [1, 1, 1]} : vector<1x8x20xf32> to vector<1x8x16xf32>
    %10 = arith.addf %8, %9 : vector<1x8x16xf32>
    %11 = vector.extract_strided_slice %7 {offsets = [0, 0, 2], sizes = [1, 8, 16], strides = [1, 1, 1]} : vector<1x8x20xf32> to vector<1x8x16xf32>
    %12 = arith.addf %10, %11 : vector<1x8x16xf32>
    %13 = vector.extract_strided_slice %7 {offsets = [0, 0, 3], sizes = [1, 8, 16], strides = [1, 1, 1]} : vector<1x8x20xf32> to vector<1x8x16xf32>
    %14 = arith.addf %12, %13 : vector<1x8x16xf32>
    %15 = vector.extract_strided_slice %7 {offsets = [0, 0, 4], sizes = [1, 8, 16], strides = [1, 1, 1]} : vector<1x8x20xf32> to vector<1x8x16xf32>
    %16 = arith.addf %14, %15 : vector<1x8x16xf32>
    %cst = arith.constant 2.000000e-01 : f32
    %17 = vector.broadcast %cst : f32 to vector<1x8x16xf32>
    %18 = arith.mulf %16, %17 : vector<1x8x16xf32>
    %c0_2 = arith.constant 0 : index
    %c0_3 = arith.constant 0 : index
    %c0_4 = arith.constant 0 : index
    %19 = vector.load %arg2[%c0_2, %c0_3, %c0_4] : memref<1x8x16xf32, #tpu.memory_space<vmem>>, vector<1x8x16xf32>
    tpu.vector_store %arg2[%c0_2, %c0_3, %c0_4], %18 {strides = array<i32>} : memref<1x8x16xf32, #tpu.memory_space<vmem>>, vector<1x8x16xf32>,
    return
  }
  func.func @transform_0(%arg0: i32) -> (i32, i32, i32) {
    %c0_i32 = arith.constant 0 : i32
    %c0_i32_0 = arith.constant 0 : i32
    %c0_i32_1 = arith.constant 0 : i32
    return %arg0, %c0_i32, %c0_i32_0 : i32, i32, i32
  }
  func.func @transform_1(%arg0: i32) -> (i32, i32, i32) {
    %c0_i32 = arith.constant 0 : i32
    %c0_i32_0 = arith.constant 0 : i32
    %c0_i32_1 = arith.constant 0 : i32
    return %arg0, %c0_i32, %c0_i32_0 : i32, i32, i32
  }
}

</mosaic_0001>

<bundles_post_ra>
// kernel: tpu_custom_call.1
= control target key start
LH: loop header
LB: loop body
LE: loop exit
PB: predicated region body
PF: predicated region fallthrough
CT: control target
= control target key end

     0   :  { %6 = vsyncpa [#allocation3], 0  ;;  %s571_s0 = inlined_call_operand.hbm [shape: f32[2,8,16], index: 0, kind: input, shape index: {}]   ;;  %s572_s1 = inlined_call_operand.hbm [shape: f32[2,8,16], index: 1, kind: output, shape index: {}]  }
   0x1   :  { %8 = vsyncpa [#allocation3 + $0x1], 0 }
   0x2   :  { %9 = vsyncpa [#allocation4], 0 }
   0x3   :  { %11 = vsyncpa [#allocation4 + $0x1], 0  ;;  %s440_s6 = smov 0   ;;  %s442_s7 = smov 0  }
   0x4   :  { %s444_s8 = smov 0   ;;  %s446_s9 = smov 0  }
   0x5 LB: > { %s461_s10 = sadd.s32 4294967295, %s421_s9   ;;  %s257_s11 = sadd.s32 4294967294, %s421_s9   ;;  %s421_s9 = sphi %s446_s9, %s582_s9   ;;  %s417_s8 = sphi %s444_s8, %s581_s8   ;;  %s413_s7 = sphi %s442_s7, %s580_s7   ;;  %s409_s6 = sphi %s440_s6, %s579_s6  }
   0x6   : > { %s465_s12 = sadd.s32 1, %s421_s9   ;;  %s24_s13 = sadd.s32 1, %s417_s8 }
   0x7   : > { %s21_s14 = ssub.s32 %s421_s9, %s465_s12  ;;  %p31_p0 = scmp.ne.s32.totalorder %s417_s8, %s413_s7 }
   0x8   : > { %p22_p1 = scmp.eq.s32.totalorder %s21_s14, 0  ;;  %p32_p2 = scmp.eq.s32.totalorder %s421_s9, 0 }
   0x9   : > { %p37_p3 = scmp.ne.s32.totalorder %s413_s7, %s409_s6  ;;  %p38_p4 = scmp.eq.s32.totalorder %s461_s10, 0 }
   0xa   : > { %s477_s15 = scalar_select %p22_p1, %s417_s8, %s24_s13  }
   0xb   : > { %p479_p5 = por %p32_p2, %p31_p0  ;;  %p483_p6 = por %p38_p4, %p37_p3 }
   0xc   : > { %p61_p7 = scmp.eq.s32.totalorder %s461_s10, 1  ;;  %p67_p8 = scmp.eq.s32.totalorder %s257_s11, 1 }
   0xd   : > { %p281_p10 = scmp.lt.s32.totalorder %s421_s9, 2  ;;  %s87_s20 = sand.u32 1, %s417_s8  }
   0xe   : > { %p490_p11 = por %p61_p7, %p31_p0  ;;  %p494_p12 = por %p67_p8, %p37_p3 }
   0xf   : > { %s261_s21 = sshll.u32 %s421_s9, 3  ;;  %s260_s22 = sshll.u32 %s87_s20, 3 }
  0x10   : > { %s95_s25 = scalar_lea.hbm %s571_s0, %s261_s21  ;;  %s91_s27 = scalar_lea.vmem [#allocation2], %s260_s22 }
  0x11   : > { %s97_s26 = sshll.u32 %s95_s25, 4  ;;  %s99_s28 = sshll.u32 %s91_s27, 4  ;;  %s98_s26 = int_to_ptr.hbm [resolvable:$true] %s97_s26  ;;  %s100_s28 = int_to_ptr.vmem [resolvable:$true] %s99_s28 }
  0x12   : > { %p505_p13 = pnand %p281_p10, %p479_p5  ;;  %p262_p0 = scmp.ge.s32.totalorder %s421_s9, 1 }
  0x13   : > { %p104_p1 = scmp.lt.s32.totalorder %s421_s9, 3  ;;  %s88_s30 = scalar_lea.sflag [#allocation3], %s87_s20 }
  0x14   : > { %s325_s2 = sshra.s32 %s98_s26, 4  ;;  %p329_p3 = pneg %p505_p13  ;;  %s326_s2 = int_to_ptr.hbm [resolvable:$true] %s325_s2 }
  0x15   : > { %s327_s3 = scalar_lea.hbm %s326_s2, 8  ;;  %s332_s11 = scalar_lea.hbm %s571_s0, 16 }
  0x16   : > { %p328_p2 = scmp.ne.s32.totalorder %s326_s2, %s327_s3  ;;  %p333_p5 = scmp.lt.s32.totalorder %s326_s2, %s571_s0 }
  0x17   : > { %p334_p8 = scmp.lt.s32.totalorder %s332_s11, %s327_s3 }
  0x18   : > { %p330_p4 = pnand %p329_p3, %p328_p2 }
  0x19   : > { %p335_p10 = por %p334_p8, %p333_p5 }
  0x1a   : > { %p331_p7 = pneg %p330_p4 }
  0x1c   : > { %p336_p9 = pnand %p335_p10, %p331_p7 }
  0x1e   : > { %339 = shalt.err (!%p336_p9)
}
  0x1f   : > { %276 = dma.hbm_to_vmem [thread:$0]  (!%p505_p13), %s98_s26, 128, %s100_s28, %s88_s30  }
  0x20   : > { %p105_p2 = pnand %p262_p0, %p104_p1 }
  0x21   : > { %s526_s16 = sand.u32 (!%p105_p2), 1, %s413_s7  }
  0x22   : > { %108 = sbr.rel (%p105_p2) target bundleno = 296 (0x128), region = 24  ;;  %s263_s20 = sshll.u32 (!%p105_p2), %s526_s16, 3 }
  0x23   : > { %s111_s21 = scalar_lea.sflag (!%p105_p2), [#allocation3], %s526_s16  ;;  %s114_s22 = scalar_lea.vmem (!%p105_p2), [#allocation2], %s263_s20 }
  0x27   : > { %400 = dma.done.wait (%p483_p6), %s111_s21, 128  }
  0x28   : > { %402 = vsyncadd (%p483_p6), %s111_s21, 4294967168  ;;  %v423_v0 = vmov 0   ;;  %v424_v1 = vmov 15   ;;  %v134_v2 = vld [vmem:[%s114_s22] sm:$0xff]  ;;  %s425_s23 = smov 2   ;;  %vm147_vm0 = vcmask 15360  }
  0x29   : > { %322 = vset.pattern.permute.xlu0 %v423_v0  ;;  %323 = vset.pattern.permute.xlu1 %v424_v1  ;;  %vm149_vm1 = vcmask 146432   ;;  %s426_s17 = smov 124   ;;  %s427_s24 = smov 126   ;;  %vm169_vm2 = vcmask 130048  }
  0x2a   : > { %137 = vperm.xlu0 %322, %v134_v2   ;;  %141 = vperm.xlu1 %323, %v134_v2   ;;  %s428_s25 = smov 127   ;;  %s429_s26 = smov 125  }
  0x2b   : > { %s266_s27 = sshll.u32 %s461_s10, 3  ;;  %s133_s2 = scalar_lea.vmem [#allocation5], %s263_s20 }
  0x2c   : > { %s182_s30 = scalar_lea.hbm %s572_s1, %s266_s27  ;;  %s184_s3 = sshll.u32 %s133_s2, 4  ;;  %s185_s3 = int_to_ptr.vmem [resolvable:$true] %s184_s3 }
  0x2d   : > { %s186_s4 = sshll.u32 %s182_s30, 4  ;;  %s172_s10 = scalar_lea.sflag [#allocation4], %s526_s16  ;;  %s187_s4 = int_to_ptr.hbm [resolvable:$true] %s186_s4 }
  0x2e   : > { %s369_s5 = sshra.s32 %s187_s4, 4  ;;  %s375_s20 = scalar_lea.hbm %s572_s1, 16  ;;  %s370_s5 = int_to_ptr.hbm [resolvable:$true] %s369_s5 }
  0x2f   : > { %s371_s11 = scalar_lea.hbm %s370_s5, 8  ;;  %p376_p0 = scmp.lt.s32.totalorder %s370_s5, %s572_s1 }
  0x30   : > { %p372_p6 = scmp.ne.s32.totalorder %s370_s5, %s371_s11  ;;  %p377_p1 = scmp.lt.s32.totalorder %s375_s20, %s371_s11 }
  0x32   : > { %144 = vrot.lane.b32.xlu0 %v134_v2, %s425_s23  ;;  %p373_p9 = pnand %p372_p6, %p490_p11  ;;  %p378_p3 = por %p377_p1, %p376_p0 }
  0x33   : > { %324 = vset.pattern.permute.xlu0 %v424_v1 }
  0x34   : > { %p374_p13 = pneg %p373_p9 }
  0x36   : > { %p379_p4 = pnand %p378_p3, %p374_p13 }
  0x9c   : > { %v138_v3 = vpop.permute.xlu0 %137  ;;  %v142_v4 = vpop.permute.xlu1 %141 }
  0xa4   : > { %v145_v5 = vpop.permute.xlu0 %144 }
  0xa5   : > { %v148_v6 = vsel %vm147_vm0, %v138_v3, %v145_v5 }
  0xa6   : > { %v150_v7 = vsel %vm149_vm1, %v148_v6, %v142_v4 }
  0xa7   : > { %164 = vrot.lane.b32.xlu0 %v150_v7, %s426_s17  ;;  %156 = vrot.lane.b32.xlu2 %v150_v7, %s427_s24 }
  0xa8   : > { %152 = vrot.lane.b32.xlu1 %v150_v7, %s428_s25 }
  0xaf   : > { %160 = vrot.lane.b32.xlu2 %v150_v7, %s429_s26 }
 0x101   : > { %v157_v8 = vpop.permute.xlu2 %156 }
 0x109   : > { %v161_v12 = vpop.permute.xlu2 %160 }
 0x119   : > { %v165_v14 = vpop.permute.xlu0 %164 }
 0x11a   : > { %v153_v9 = vpop.permute.xlu1 %152 }
 0x11b   : > { %v155_v10 = vadd.f32 %v153_v9, %v150_v7 }
 0x11d   : > { %v159_v11 = vadd.f32 %v157_v8, %v155_v10 }
 0x11f   : > { %v163_v13 = vadd.f32 %v161_v12, %v159_v11 }
 0x121   : > { %v167_v15 = vadd.f32 %v165_v14, %v163_v13 }
 0x123   : > { %v168_v16 = vmul.f32 0.2, %v167_v15 }
 0x125   : > { %170 = vst.msk [vmem:[%s133_s2] sm:$0xff] %vm169_vm2, %v168_v16 }
 0x126   : > { %382 = shalt.err (!%p379_p4)
}
 0x127   : > { %271 = dma.vmem_to_hbm [thread:$0]  (%p490_p11), %s185_s3, 128, %s187_s4, %s172_s10  }
 0x128 PF: > { %s198_s16 = sand.u32 1, %s409_s6   ;;  %p578_p7 = scmp.ge.s32.totalorder %s421_s9, 2 }
 0x129   : > { %s199_s23 = scalar_lea.sflag [#allocation4], %s198_s16 }
 0x12a   : > { %p278_p5 = pnand %p578_p7, %p494_p12 }
 0x12c   : > { %p279_p8 = pneg %p278_p5 }
 0x12e   : > { %404 = dma.done.wait (%p279_p8), %s199_s23, 128  }
 0x12f   : > { %406 = vsyncadd (%p279_p8), %s199_s23, 4294967168  ;;  %p14_p10 = scmp.ge.s32.totalorder %s465_s12, 4   ;;  %s579_s6 = smov %s413_s7 }
 0x130   : > { %s580_s7 = smov %s417_s8  ;;  %s581_s8 = smov %s477_s15 }
 0x131   : > { %s582_s9 = smov %s465_s12  ;;  %16 = sbr.rel (!%p14_p10) target bundleno = 5 (0x5), region = 69 }
 0x136   :  { %205 = vsyncpa [#allocation3], 1 }
 0x137   :  { %207 = vsyncpa [#allocation3 + $0x1], 1 }
 0x138   :  { %208 = vsyncpa [#allocation4], 1 }
 0x139   :  { %210 = vsyncpa [#allocation4 + $0x1], 1 }

</bundles_post_ra>
